<compile_context>
chip_gen: v7x
topology: tpu7x:2x2x1
jax: 0.10.0
libtpu: 0.0.40
codegen_flags: <defaults>
</compile_context>

<pallas_src>
import functools

import jax
import jax.numpy as jnp
from jax import lax
from jax.experimental import pallas as pl
from jax.experimental.pallas import tpu as pltpu

NEG_INF = -1e30  # finite large-negative mask value (avoids -inf -> NaN paths)


def _attention_head_kernel(
    xq_ref,      # (BBLK, TQ, E)   query-side activations (compute dtype)
    xk_ref,      # (BBLK, TK, E)   key/value-side activations (compute dtype)
    wq_ref,      # (E, Hs)         query weight, pre-scaled by head_size**-0.5
    wkv_ref,     # (E, 2*Hs)       fused key/value weight
    o_ref,       # (BBLK, TQ, Hs)  output
    q_sc,        # (BBLK, TQ, Hs)  scratch: cached Q projection (compute dtype)
    m_sc,        # (BBLK, TQ, 1)   f32 scratch: running max
    l_sc,        # (BBLK, TQ, 1)   f32 scratch: running denominator
    acc_sc,      # (BBLK, TQ, Hs)  f32 scratch: running numerator
    *, head_size, tq, tk,
):
    qi = pl.program_id(1)
    ki = pl.program_id(2)
    nk = pl.num_programs(2)

    bblk = xq_ref.shape[0]
    emb = xq_ref.shape[-1]
    cdt = xk_ref.dtype                       # compute dtype for MXU inputs

    @pl.when(ki == 0)
    def _init():
        # Project queries once per (batch-block, q-tile); scale already folded
        # into wq in the wrapper.  Flatten leading dims -> one wide MXU matmul.
        xq2 = xq_ref[...].reshape(bblk * tq, emb)
        q2 = jnp.dot(xq2, wq_ref[...], preferred_element_type=jnp.float32)
        q_sc[...] = q2.reshape(bblk, tq, head_size).astype(q_sc.dtype)
        m_sc[...] = jnp.full_like(m_sc, NEG_INF)
        l_sc[...] = jnp.zeros_like(l_sc)
        acc_sc[...] = jnp.zeros_like(acc_sc)

    q_start = qi * tq
    k_start = ki * tk

    # Causal: skip key tiles entirely in the future of this query tile.
    @pl.when(k_start <= q_start + (tq - 1))
    def _compute():
        # Fused K/V projection: one (TK*BBLK, E) @ (E, 2*Hs) MXU matmul,
        # then static lane slices (no concatenate needed anywhere).
        xk2 = xk_ref[...].reshape(bblk * tk, emb)
        kv2 = jnp.dot(xk2, wkv_ref[...], preferred_element_type=jnp.float32)
        kv = kv2.reshape(bblk, tk, 2 * head_size)
        k = kv[..., :head_size].astype(cdt)
        v = kv[..., head_size:].astype(cdt)

        s = jnp.einsum("bqh,bkh->bqk", q_sc[...], k,
                       preferred_element_type=jnp.float32)

        # Additive finite causal mask (one compare+select, then a single vadd).
        rows = q_start + lax.broadcasted_iota(jnp.int32, (tq, tk), 0)
        cols = k_start + lax.broadcasted_iota(jnp.int32, (tq, tk), 1)
        bias = jnp.where(cols <= rows, 0.0, NEG_INF).astype(jnp.float32)
        s = s + bias[None, :, :]

        # Online (flash) softmax update, all in f32.
        m_prev = m_sc[...]
        m_new = jnp.maximum(m_prev, jnp.max(s, axis=-1, keepdims=True))
        alpha = jnp.exp(m_prev - m_new)
        p = jnp.exp(s - m_new)
        l_sc[...] = alpha * l_sc[...] + jnp.sum(p, axis=-1, keepdims=True)
        acc_sc[...] = alpha * acc_sc[...] + jnp.einsum(
            "bqk,bkh->bqh", p.astype(cdt), v,
            preferred_element_type=jnp.float32)
        m_sc[...] = m_new

    @pl.when(ki == nk - 1)
    def _finalize():
        # Softmax normalization via EUP approximate reciprocal (not a VPU divide).
        # Dropout on the attention weights is identity in eval mode.
        inv_l = pl.reciprocal(l_sc[...], approx=True)
        o_ref[...] = (acc_sc[...] * inv_l).astype(o_ref.dtype)


def _pick_tile(total, target):
    """Largest multiple-of-8 divisor of `total` that is <= target, else `total`."""
    if total <= target:
        return total
    for cand in range(min(target, total), 7, -1):
        if total % cand == 0 and cand % 8 == 0:
            return cand
    return total


def _largest_divisor_leq(n, target):
    for d in range(min(n, max(target, 1)), 0, -1):
        if n % d == 0:
            return d
    return 1


def self_attention_head(x, wq_t, wk_t, wv_t, *, compute_dtype=jnp.bfloat16,
                        q_tile=256, k_tile=256):
    """x: (B, T, E); wq_t/wk_t/wv_t: (head_size, E)  (torch nn.Linear layout)."""
    B, T, E = x.shape
    Hs = wq_t.shape[0]
    scale = Hs ** (-0.5)

    tq = _pick_tile(T, q_tile)
    tk = _pick_tile(T, k_tile)
    # Batch-block so each grid step processes a reasonable number of rows
    # (amortizes per-step overhead at small T); requires sublane-aligned T.
    bblk = _largest_divisor_leq(B, max(1, 256 // tq)) if T % 8 == 0 else 1

    # Math layout (E, Hs); fold the softmax scale into Wq; fuse K and V weights.
    wq = (wq_t.T * scale).astype(compute_dtype)                     # (E, Hs)
    wkv = jnp.concatenate([wk_t.T, wv_t.T], axis=1).astype(compute_dtype)  # (E, 2Hs)
    xc = x.astype(compute_dtype)

    grid = (B // bblk, T // tq, T // tk)
    kernel = functools.partial(_attention_head_kernel,
                               head_size=Hs, tq=tq, tk=tk)

    return pl.pallas_call(
        kernel,
        out_shape=jax.ShapeDtypeStruct((B, T, Hs), x.dtype),
        grid_spec=pltpu.PrefetchScalarGridSpec(
            num_scalar_prefetch=0,
            grid=grid,
            in_specs=[
                pl.BlockSpec((bblk, tq, E), lambda b, qi, ki: (b, qi, 0)),   # x (Q side)
                pl.BlockSpec((bblk, tk, E), lambda b, qi, ki: (b, ki, 0)),   # x (K/V side)
                pl.BlockSpec((E, Hs), lambda b, qi, ki: (0, 0)),             # Wq (scaled)
                pl.BlockSpec((E, 2 * Hs), lambda b, qi, ki: (0, 0)),         # Wkv (fused)
            ],
            out_specs=pl.BlockSpec((bblk, tq, Hs), lambda b, qi, ki: (b, qi, 0)),
            scratch_shapes=[
                pltpu.VMEM((bblk, tq, Hs), compute_dtype),   # cached Q
                pltpu.VMEM((bblk, tq, 1), jnp.float32),      # running max
                pltpu.VMEM((bblk, tq, 1), jnp.float32),      # running denom
                pltpu.VMEM((bblk, tq, Hs), jnp.float32),     # running numerator
            ],
        ),
        compiler_params=pltpu.CompilerParams(
            dimension_semantics=("parallel", "parallel", "arbitrary"),
            vmem_limit_bytes=64 * 1024 * 1024,
        ),
    )(xc, xc, wq, wkv)


def reference_head(x, wq_t, wk_t, wv_t):
    """Pure-JAX reference matching the PyTorch forward (eval mode, f32)."""
    Hs = wq_t.shape[0]
    T = x.shape[1]
    q = x @ wq_t.T
    k = x @ wk_t.T
    v = x @ wv_t.T
    s = (q @ jnp.swapaxes(k, -1, -2)) * Hs ** (-0.5)
    mask = jnp.tril(jnp.ones((T, T), bool))
    s = jnp.where(mask, s, -jnp.inf)
    w = jax.nn.softmax(s, axis=-1)
    return w @ v   # dropout(p=0.1) is identity in eval mode


if __name__ == "__main__":
    # Small shapes implied by the module: (batch, sequence, embedding), head_size
    B, T, E, HS = 2, 8, 32, 16
    key = jax.random.PRNGKey(0)
    kx, kq, kk, kv = jax.random.split(key, 4)
    x = jax.random.normal(kx, (B, T, E), jnp.float32)
    w_scale = 1.0 / jnp.sqrt(E)
    wq_t = jax.random.normal(kq, (HS, E), jnp.float32) * w_scale  # torch layout
    wk_t = jax.random.normal(kk, (HS, E), jnp.float32) * w_scale
    wv_t = jax.random.normal(kv, (HS, E), jnp.float32) * w_scale

    ref = reference_head(x, wq_t, wk_t, wv_t)

    # f32 compute path: tight-ish check (only approx reciprocal deviates).
    out_f32 = jax.block_until_ready(
        self_attention_head(x, wq_t, wk_t, wv_t, compute_dtype=jnp.float32))
    assert out_f32.shape == (B, T, HS)
    assert jnp.allclose(out_f32, ref, atol=3e-2, rtol=3e-2), (
        float(jnp.max(jnp.abs(out_f32 - ref))))

    # Default bf16 MXU path (performance configuration): looser sanity check.
    out_bf16 = jax.block_until_ready(self_attention_head(x, wq_t, wk_t, wv_t))
    assert out_bf16.shape == (B, T, HS)
    assert jnp.allclose(out_bf16, ref, atol=1.5e-1, rtol=1.5e-1), (
        float(jnp.max(jnp.abs(out_bf16 - ref))))

    print("KERNEL_OK")
</pallas_src>

<mosaic_0001>
module attributes {stable_mosaic.version = 11 : i64} {
  func.func @_attention_head_kernel(%arg0: i32, %arg1: i32, %arg2: i32, %arg3: memref<2x8x32xf32, #tpu.memory_space<vmem>>, %arg4: memref<2x8x32xf32, #tpu.memory_space<vmem>>, %arg5: memref<32x16xf32, #tpu.memory_space<vmem>>, %arg6: memref<32x32xf32, #tpu.memory_space<vmem>>, %arg7: memref<2x8x16xf32, #tpu.memory_space<vmem>>, %arg8: memref<2x8x16xf32, #tpu.memory_space<vmem>>, %arg9: memref<2x8x1xf32, #tpu.memory_space<vmem>>, %arg10: memref<2x8x1xf32, #tpu.memory_space<vmem>>, %arg11: memref<2x8x16xf32, #tpu.memory_space<vmem>>) attributes {dimension_semantics = [#tpu.dimension_semantics<parallel>, #tpu.dimension_semantics<parallel>, #tpu.dimension_semantics<arbitrary>], iteration_bounds = array<i64: 1, 1, 1>, scalar_prefetch = 0 : i64, scratch_operands = 4 : i64, tpu.core_type = #tpu.core_type<tc>, window_params = [{transform_indices = @transform_0, window_bounds = array<i64: 2, 8, 32>}, {transform_indices = @transform_1, window_bounds = array<i64: 2, 8, 32>}, {pipeline_mode = #tpu.pipeline_mode<synchronous>, transform_indices = @transform_2, window_bounds = array<i64: 32, 16>}, {pipeline_mode = #tpu.pipeline_mode<synchronous>, transform_indices = @transform_3, window_bounds = array<i64: 32, 32>}, {transform_indices = @transform_4, window_bounds = array<i64: 2, 8, 16>}]} {
    %c0_i32 = arith.constant 0 : i32
    %0 = arith.cmpi eq, %arg2, %c0_i32 : i32
    %1 = arith.extui %0 : i1 to i32
    %c0_i32_0 = arith.constant 0 : i32
    %2 = arith.cmpi ne, %1, %c0_i32_0 : i32
    scf.if %2 {
      %c0 = arith.constant 0 : index
      %c0_5 = arith.constant 0 : index
      %c0_6 = arith.constant 0 : index
      %12 = vector.load %arg3[%c0, %c0_5, %c0_6] : memref<2x8x32xf32, #tpu.memory_space<vmem>>, vector<2x8x32xf32>
      %13 = vector.shape_cast %12 : vector<2x8x32xf32> to vector<16x32xf32>
      %c0_7 = arith.constant 0 : index
      %c0_8 = arith.constant 0 : index
      %14 = vector.load %arg5[%c0_7, %c0_8] : memref<32x16xf32, #tpu.memory_space<vmem>>, vector<32x16xf32>
      %cst = arith.constant dense<0.000000e+00> : vector<16x16xf32>
      %15 = tpu.matmul %13, %14, %cst {dimension_numbers = #tpu.dot_dimension_numbers<[1], [0], [0], [1], [0, 0, 1, 1], [], []>} : vector<16x32xf32>, vector<32x16xf32>, vector<16x16xf32> -> vector<16x16xf32>
      %16 = vector.shape_cast %15 : vector<16x16xf32> to vector<2x8x16xf32>
      %c0_9 = arith.constant 0 : index
      %c0_10 = arith.constant 0 : index
      %c0_11 = arith.constant 0 : index
      %17 = vector.load %arg8[%c0_9, %c0_10, %c0_11] : memref<2x8x16xf32, #tpu.memory_space<vmem>>, vector<2x8x16xf32>
      tpu.vector_store %arg8[%c0_9, %c0_10, %c0_11], %16 {strides = array<i32>} : memref<2x8x16xf32, #tpu.memory_space<vmem>>, vector<2x8x16xf32>,
      %cst_12 = arith.constant -1.000000e+30 : f32
      %18 = vector.broadcast %cst_12 : f32 to vector<2x8x1xf32>
      %c0_13 = arith.constant 0 : index
      %c0_14 = arith.constant 0 : index
      %c0_15 = arith.constant 0 : index
      %19 = vector.load %arg9[%c0_13, %c0_14, %c0_15] : memref<2x8x1xf32, #tpu.memory_space<vmem>>, vector<2x8x1xf32>
      tpu.vector_store %arg9[%c0_13, %c0_14, %c0_15], %18 {strides = array<i32>} : memref<2x8x1xf32, #tpu.memory_space<vmem>>, vector<2x8x1xf32>,
      %cst_16 = arith.constant 0.000000e+00 : f32
      %20 = vector.broadcast %cst_16 : f32 to vector<2x8x1xf32>
      %c0_17 = arith.constant 0 : index
      %c0_18 = arith.constant 0 : index
      %c0_19 = arith.constant 0 : index
      %21 = vector.load %arg10[%c0_17, %c0_18, %c0_19] : memref<2x8x1xf32, #tpu.memory_space<vmem>>, vector<2x8x1xf32>
      tpu.vector_store %arg10[%c0_17, %c0_18, %c0_19], %20 {strides = array<i32>} : memref<2x8x1xf32, #tpu.memory_space<vmem>>, vector<2x8x1xf32>,
      %cst_20 = arith.constant 0.000000e+00 : f32
      %22 = vector.broadcast %cst_20 : f32 to vector<2x8x16xf32>
      %c0_21 = arith.constant 0 : index
      %c0_22 = arith.constant 0 : index
      %c0_23 = arith.constant 0 : index
      %23 = vector.load %arg11[%c0_21, %c0_22, %c0_23] : memref<2x8x16xf32, #tpu.memory_space<vmem>>, vector<2x8x16xf32>
      tpu.vector_store %arg11[%c0_21, %c0_22, %c0_23], %22 {strides = array<i32>} : memref<2x8x16xf32, #tpu.memory_space<vmem>>, vector<2x8x16xf32>,
    } else {
    }
    %c8_i32 = arith.constant 8 : i32
    %3 = arith.muli %arg1, %c8_i32 : i32
    %c8_i32_1 = arith.constant 8 : i32
    %4 = arith.muli %arg2, %c8_i32_1 : i32
    %c7_i32 = arith.constant 7 : i32
    %5 = arith.addi %3, %c7_i32 : i32
    %6 = arith.cmpi sle, %4, %5 : i32
    %7 = arith.extui %6 : i1 to i32
    %c0_i32_2 = arith.constant 0 : i32
    %8 = arith.cmpi ne, %7, %c0_i32_2 : i32
    scf.if %8 {
      %c0 = arith.constant 0 : index
      %c0_5 = arith.constant 0 : index
      %c0_6 = arith.constant 0 : index
      %12 = vector.load %arg4[%c0, %c0_5, %c0_6] : memref<2x8x32xf32, #tpu.memory_space<vmem>>, vector<2x8x32xf32>
      %13 = vector.shape_cast %12 : vector<2x8x32xf32> to vector<16x32xf32>
      %c0_7 = arith.constant 0 : index
      %c0_8 = arith.constant 0 : index
      %14 = vector.load %arg6[%c0_7, %c0_8] : memref<32x32xf32, #tpu.memory_space<vmem>>, vector<32x32xf32>
      %cst = arith.constant dense<0.000000e+00> : vector<16x32xf32>
      %15 = tpu.matmul %13, %14, %cst {dimension_numbers = #tpu.dot_dimension_numbers<[1], [0], [0], [1], [0, 0, 1, 1], [], []>} : vector<16x32xf32>, vector<32x32xf32>, vector<16x32xf32> -> vector<16x32xf32>
      %16 = vector.shape_cast %15 : vector<16x32xf32> to vector<2x8x32xf32>
      %17 = vector.extract_strided_slice %16 {offsets = [0, 0, 0], sizes = [2, 8, 16], strides = [1, 1, 1]} : vector<2x8x32xf32> to vector<2x8x16xf32>
      %18 = vector.extract_strided_slice %16 {offsets = [0, 0, 16], sizes = [2, 8, 16], strides = [1, 1, 1]} : vector<2x8x32xf32> to vector<2x8x16xf32>
      %c0_9 = arith.constant 0 : index
      %c0_10 = arith.constant 0 : index
      %c0_11 = arith.constant 0 : index
      %19 = vector.load %arg8[%c0_9, %c0_10, %c0_11] : memref<2x8x16xf32, #tpu.memory_space<vmem>>, vector<2x8x16xf32>
      "tpu.trace_start"() <{level = 10 : i32, message = "bqh,bkh->bqk"}> : () -> ()
      %cst_12 = arith.constant dense<0.000000e+00> : vector<2x8x8xf32>
      %20 = tpu.matmul %19, %17, %cst_12 {dimension_numbers = #tpu.dot_dimension_numbers<[2], [2], [1], [1], [0, 0, 0, 1, 1, 1], [0], [0]>} : vector<2x8x16xf32>, vector<2x8x16xf32>, vector<2x8x8xf32> -> vector<2x8x8xf32>
      "tpu.trace_stop"() : () -> ()
      %21 = tpu.iota {dimensions = array<i32: 0>} : vector<8x8xi32>
      %22 = vector.broadcast %3 : i32 to vector<8x8xi32>
      %23 = arith.addi %22, %21 : vector<8x8xi32>
      %24 = tpu.iota {dimensions = array<i32: 1>} : vector<8x8xi32>
      %25 = vector.broadcast %4 : i32 to vector<8x8xi32>
      %26 = arith.addi %25, %24 : vector<8x8xi32>
      %27 = arith.cmpi sle, %26, %23 : vector<8x8xi32>
      %cst_13 = arith.constant 0.000000e+00 : f32
      %cst_14 = arith.constant -1.000000e+30 : f32
      %28 = vector.broadcast %cst_13 : f32 to vector<8x8xf32>
      %29 = vector.broadcast %cst_14 : f32 to vector<8x8xf32>
      %30 = arith.select %27, %28, %29 : vector<8x8xi1>, vector<8x8xf32>
      %31 = vector.shape_cast %30 : vector<8x8xf32> to vector<1x8x8xf32>
      %32 = vector.broadcast %31 : vector<1x8x8xf32> to vector<2x8x8xf32>
      %33 = arith.addf %20, %32 : vector<2x8x8xf32>
      %c0_15 = arith.constant 0 : index
      %c0_16 = arith.constant 0 : index
      %c0_17 = arith.constant 0 : index
      %34 = vector.load %arg9[%c0_15, %c0_16, %c0_17] : memref<2x8x1xf32, #tpu.memory_space<vmem>>, vector<2x8x1xf32>
      %cst_18 = arith.constant dense<0xFF800000> : vector<2x8xf32>
      %35 = vector.multi_reduction <maximumf>, %33, %cst_18 [2] : vector<2x8x8xf32> to vector<2x8xf32>
      %36 = vector.shape_cast %35 : vector<2x8xf32> to vector<2x8x1xf32>
      %37 = arith.maximumf %34, %36 : vector<2x8x1xf32>
      %38 = arith.subf %34, %37 : vector<2x8x1xf32>
      %39 = math.exp %38 : vector<2x8x1xf32>
      %40 = vector.broadcast %37 : vector<2x8x1xf32> to vector<2x8x8xf32>
      %41 = arith.subf %33, %40 : vector<2x8x8xf32>
      %42 = math.exp %41 : vector<2x8x8xf32>
      %c0_19 = arith.constant 0 : index
      %c0_20 = arith.constant 0 : index
      %c0_21 = arith.constant 0 : index
      %43 = vector.load %arg10[%c0_19, %c0_20, %c0_21] : memref<2x8x1xf32, #tpu.memory_space<vmem>>, vector<2x8x1xf32>
      %44 = arith.mulf %39, %43 : vector<2x8x1xf32>
      %cst_22 = arith.constant dense<0.000000e+00> : vector<2x8xf32>
      %45 = vector.multi_reduction <add>, %42, %cst_22 [2] : vector<2x8x8xf32> to vector<2x8xf32>
      %46 = vector.shape_cast %45 : vector<2x8xf32> to vector<2x8x1xf32>
      %47 = arith.addf %44, %46 : vector<2x8x1xf32>
      %c0_23 = arith.constant 0 : index
      %c0_24 = arith.constant 0 : index
      %c0_25 = arith.constant 0 : index
      %48 = vector.load %arg10[%c0_23, %c0_24, %c0_25] : memref<2x8x1xf32, #tpu.memory_space<vmem>>, vector<2x8x1xf32>
      tpu.vector_store %arg10[%c0_23, %c0_24, %c0_25], %47 {strides = array<i32>} : memref<2x8x1xf32, #tpu.memory_space<vmem>>, vector<2x8x1xf32>,
      %c0_26 = arith.constant 0 : index
      %c0_27 = arith.constant 0 : index
      %c0_28 = arith.constant 0 : index
      %49 = vector.load %arg11[%c0_26, %c0_27, %c0_28] : memref<2x8x16xf32, #tpu.memory_space<vmem>>, vector<2x8x16xf32>
      %50 = vector.broadcast %39 : vector<2x8x1xf32> to vector<2x8x16xf32>
      %51 = arith.mulf %50, %49 : vector<2x8x16xf32>
      "tpu.trace_start"() <{level = 10 : i32, message = "bqk,bkh->bqh"}> : () -> ()
      %cst_29 = arith.constant dense<0.000000e+00> : vector<2x8x16xf32>
      %52 = tpu.matmul %42, %18, %cst_29 {dimension_numbers = #tpu.dot_dimension_numbers<[2], [1], [1], [2], [0, 0, 0, 1, 1, 2], [0], [0]>} : vector<2x8x8xf32>, vector<2x8x16xf32>, vector<2x8x16xf32> -> vector<2x8x16xf32>
      "tpu.trace_stop"() : () -> ()
      %53 = arith.addf %51, %52 : vector<2x8x16xf32>
      %c0_30 = arith.constant 0 : index
      %c0_31 = arith.constant 0 : index
      %c0_32 = arith.constant 0 : index
      %54 = vector.load %arg11[%c0_30, %c0_31, %c0_32] : memref<2x8x16xf32, #tpu.memory_space<vmem>>, vector<2x8x16xf32>
      tpu.vector_store %arg11[%c0_30, %c0_31, %c0_32], %53 {strides = array<i32>} : memref<2x8x16xf32, #tpu.memory_space<vmem>>, vector<2x8x16xf32>,
      %c0_33 = arith.constant 0 : index
      %c0_34 = arith.constant 0 : index
      %c0_35 = arith.constant 0 : index
      %55 = vector.load %arg9[%c0_33, %c0_34, %c0_35] : memref<2x8x1xf32, #tpu.memory_space<vmem>>, vector<2x8x1xf32>
      tpu.vector_store %arg9[%c0_33, %c0_34, %c0_35], %37 {strides = array<i32>} : memref<2x8x1xf32, #tpu.memory_space<vmem>>, vector<2x8x1xf32>,
    } else {
    }
    %c0_i32_3 = arith.constant 0 : i32
    %9 = arith.cmpi eq, %arg2, %c0_i32_3 : i32
    %10 = arith.extui %9 : i1 to i32
    %c0_i32_4 = arith.constant 0 : i32
    %11 = arith.cmpi ne, %10, %c0_i32_4 : i32
    scf.if %11 {
      %c0 = arith.constant 0 : index
      %c0_5 = arith.constant 0 : index
      %c0_6 = arith.constant 0 : index
      %12 = vector.load %arg10[%c0, %c0_5, %c0_6] : memref<2x8x1xf32, #tpu.memory_space<vmem>>, vector<2x8x1xf32>
      %13 = tpu.reciprocal %12 {approx = true} : vector<2x8x1xf32> -> vector<2x8x1xf32>
      %c0_7 = arith.constant 0 : index
      %c0_8 = arith.constant 0 : index
      %c0_9 = arith.constant 0 : index
      %14 = vector.load %arg11[%c0_7, %c0_8, %c0_9] : memref<2x8x16xf32, #tpu.memory_space<vmem>>, vector<2x8x16xf32>
      %15 = vector.broadcast %13 : vector<2x8x1xf32> to vector<2x8x16xf32>
      %16 = arith.mulf %14, %15 : vector<2x8x16xf32>
      %c0_10 = arith.constant 0 : index
      %c0_11 = arith.constant 0 : index
      %c0_12 = arith.constant 0 : index
      %17 = vector.load %arg7[%c0_10, %c0_11, %c0_12] : memref<2x8x16xf32, #tpu.memory_space<vmem>>, vector<2x8x16xf32>
      tpu.vector_store %arg7[%c0_10, %c0_11, %c0_12], %16 {strides = array<i32>} : memref<2x8x16xf32, #tpu.memory_space<vmem>>, vector<2x8x16xf32>,
    } else {
    }
    return
  }
  func.func @transform_0(%arg0: i32, %arg1: i32, %arg2: i32) -> (i32, i32, i32) {
    %c0_i32 = arith.constant 0 : i32
    %c0_i32_0 = arith.constant 0 : i32
    return %arg0, %arg1, %c0_i32 : i32, i32, i32
  }
  func.func @transform_1(%arg0: i32, %arg1: i32, %arg2: i32) -> (i32, i32, i32) {
    %c0_i32 = arith.constant 0 : i32
    %c0_i32_0 = arith.constant 0 : i32
    return %arg0, %arg2, %c0_i32 : i32, i32, i32
  }
  func.func @transform_2(%arg0: i32, %arg1: i32, %arg2: i32) -> (i32, i32) {
    %c0_i32 = arith.constant 0 : i32
    %c0_i32_0 = arith.constant 0 : i32
    %c0_i32_1 = arith.constant 0 : i32
    return %c0_i32, %c0_i32_0 : i32, i32
  }
  func.func @transform_3(%arg0: i32, %arg1: i32, %arg2: i32) -> (i32, i32) {
    %c0_i32 = arith.constant 0 : i32
    %c0_i32_0 = arith.constant 0 : i32
    %c0_i32_1 = arith.constant 0 : i32
    return %c0_i32, %c0_i32_0 : i32, i32
  }
  func.func @transform_4(%arg0: i32, %arg1: i32, %arg2: i32) -> (i32, i32, i32) {
    %c0_i32 = arith.constant 0 : i32
    %c0_i32_0 = arith.constant 0 : i32
    return %arg0, %arg1, %c0_i32 : i32, i32, i32
  }
}

</mosaic_0001>

<bundles_post_ra>
// kernel: tpu_custom_call.1
= control target key start
LH: loop header
LB: loop body
LE: loop exit
PB: predicated region body
PF: predicated region fallthrough
CT: control target
= control target key end

     0   :  { %9 = vsyncpa [#allocation7], 0  ;;  %s1090_s0 = inlined_call_operand.hbm [shape: f32[2,8,32], index: 0, kind: input, shape index: {}]   ;;  %s1091_s1 = inlined_call_operand.hbm [shape: f32[2,8,32], index: 1, kind: input, shape index: {}]   ;;  %s1092_s2 = inlined_call_operand.hbm [shape: f32[32,16], index: 2, kind: input, shape index: {}]   ;;  %s1093_s3 = inlined_call_operand.hbm [shape: f32[32,32], index: 3, kind: input, shape index: {}]   ;;  %s1094_s4 = inlined_call_operand.hbm [shape: f32[2,8,16], index: 4, kind: output, shape index: {}]  }
   0x1   :  { %10 = vsyncpa [#allocation10], 0 }
   0x2   :  { %11 = vsyncpa [#allocation13], 0 }
   0x3   :  { %12 = vsyncpa [#allocation8], 0  ;;  %s930_s15 = smov [#allocation9]   ;;  %s931_s17 = smov [#allocation6]  }
   0x4   :  { %s30_s16 = sshll.u32 %s930_s15, 4  ;;  %s18_s18 = sshll.u32 %s931_s17, 4  ;;  %s31_s16 = int_to_ptr.vmem [resolvable:$true] %s30_s16  ;;  %s967_s18 = int_to_ptr.vmem [resolvable:$true] %s18_s18 }
   0x5   :  { %s812_s21 = scalar_lea.hbm %s1091_s1, 256 }
   0x6   :  { %p813_p0 = scmp.ne.s32.totalorder %s1091_s1, %s812_s21  ;;  %p816_p1 = scmp.lt.u32.totalorder %s812_s21, %s1091_s1 }
   0x8   :  { %p818_p2 = pnand %p816_p1, %p813_p0 }
   0xa   :  { %821 = shalt.err (!%p818_p2)
}
   0xb   :  { %s822_s26 = scalar_lea.vmem %s31_s16, 256  ;;  %p827_p4 = scmp.lt.s32.totalorder %s31_s16, %s31_s16 }
   0xc   :  { %p823_p3 = scmp.ne.s32.totalorder %s31_s16, %s822_s26  ;;  %p828_p5 = scmp.lt.s32.totalorder %s822_s26, %s822_s26 }
   0xe   :  { %p829_p6 = por %p828_p5, %p827_p4 }
  0x10   :  { %p830_p7 = pnand %p829_p6, %p823_p3 }
  0x12   :  { %833 = shalt.err (!%p830_p7)
}
  0x13   :  { %s932_s27 = smov 128   ;;  %s933_s28 = smov 8  }
  0x14   :  { %36 = dma.hbm_to_vmem [thread:$0]  %s1091_s1, 256, %s31_s16, [#allocation10], %s932_s27, %s932_s27, %s933_s28  }
  0x15   :  { %s834_s7 = scalar_lea.hbm %s1090_s0, 256 }
  0x16   :  { %p835_p8 = scmp.ne.s32.totalorder %s1090_s0, %s834_s7  ;;  %p838_p9 = scmp.lt.u32.totalorder %s834_s7, %s1090_s0 }
  0x18   :  { %p840_p10 = pnand %p838_p9, %p835_p8 }
  0x1a   :  { %843 = shalt.err (!%p840_p10)
}
  0x1b   :  { %s844_s12 = scalar_lea.vmem %s967_s18, 256  ;;  %p849_p12 = scmp.lt.s32.totalorder %s967_s18, %s967_s18 }
  0x1c   :  { %p845_p11 = scmp.ne.s32.totalorder %s967_s18, %s844_s12  ;;  %p850_p13 = scmp.lt.s32.totalorder %s844_s12, %s844_s12 }
  0x1e   :  { %p851_p0 = por %p850_p13, %p849_p12 }
  0x20   :  { %p852_p1 = pnand %p851_p0, %p845_p11 }
  0x22   :  { %855 = shalt.err (!%p852_p1)
}
  0x23   :  { %24 = dma.hbm_to_vmem [thread:$0]  %s1090_s0, 256, %s967_s18, [#allocation7], %s932_s27, %s932_s27, %s933_s28  }
  0x24   :  { %s934_s14 = smov [#allocation11]   ;;  %s935_s16 = smov [#allocation12]  }
  0x25   :  { %s42_s15 = sshll.u32 %s934_s14, 4  ;;  %s54_s17 = sshll.u32 %s935_s16, 4  ;;  %s43_s15 = int_to_ptr.vmem [resolvable:$true] %s42_s15  ;;  %s1004_s17 = int_to_ptr.vmem [resolvable:$true] %s54_s17 }
  0x26   :  { %s856_s21 = scalar_lea.hbm %s1092_s2, 512 }
  0x27   :  { %p857_p2 = scmp.ne.s32.totalorder %s1092_s2, %s856_s21  ;;  %p860_p3 = scmp.lt.u32.totalorder %s856_s21, %s1092_s2 }
  0x29   :  { %p862_p4 = pnand %p860_p3, %p857_p2 }
  0x2b   :  { %865 = shalt.err (!%p862_p4)
}
  0x2c   :  { %s866_s0 = scalar_lea.vmem %s43_s15, 512  ;;  %p871_p6 = scmp.lt.s32.totalorder %s43_s15, %s43_s15 }
  0x2d   :  { %p867_p5 = scmp.ne.s32.totalorder %s43_s15, %s866_s0  ;;  %p872_p7 = scmp.lt.s32.totalorder %s866_s0, %s866_s0 }
  0x2f   :  { %p873_p8 = por %p872_p7, %p871_p6 }
  0x31   :  { %p874_p9 = pnand %p873_p8, %p867_p5 }
  0x33   :  { %877 = shalt.err (!%p874_p9)
}
  0x34   :  { %48 = dma.hbm_to_vmem [thread:$0]  %s1092_s2, 512, %s43_s15, [#allocation10], %s932_s27, %s932_s27, %s933_s28  }
  0x35   :  { %s878_s5 = scalar_lea.hbm %s1093_s3, 512 }
  0x36   :  { %p879_p10 = scmp.ne.s32.totalorder %s1093_s3, %s878_s5  ;;  %p882_p11 = scmp.lt.u32.totalorder %s878_s5, %s1093_s3 }
  0x38   :  { %p884_p12 = pnand %p882_p11, %p879_p10 }
  0x3a   :  { %887 = shalt.err (!%p884_p12)
}
  0x3b   :  { %s888_s10 = scalar_lea.vmem %s1004_s17, 512  ;;  %p893_p0 = scmp.lt.s32.totalorder %s1004_s17, %s1004_s17 }
  0x3c   :  { %p889_p13 = scmp.ne.s32.totalorder %s1004_s17, %s888_s10  ;;  %p894_p1 = scmp.lt.s32.totalorder %s888_s10, %s888_s10 }
  0x3e   :  { %p895_p2 = por %p894_p1, %p893_p0 }
  0x40   :  { %p896_p3 = pnand %p895_p2, %p889_p13 }
  0x42   :  { %899 = shalt.err (!%p896_p3)
}
  0x43   :  { %60 = dma.hbm_to_vmem [thread:$0]  %s1093_s3, 512, %s1004_s17, [#allocation13], %s932_s27, %s932_s27, %s933_s28  }
  0x44   :  { %922 = dma.done.wait [#allocation7], 256  }
  0x45   :  { %923 = vsyncadd [#allocation7], 4294967040 }
  0x46   :  { %924 = dma.done.wait [#allocation10], 768  }
  0x47   :  { %925 = vsyncadd [#allocation10], 4294966528 }
  0x48   :  { %926 = dma.done.wait [#allocation13], 512  }
  0x49   :  { %927 = vsyncadd [#allocation13], 4294966784  ;;  %v79_v0 = vld [vmem:[#allocation11] sm:$0xff]  ;;  %v80_v1 = vld [vmem:[#allocation11 + $0x8] sm:$0xff]  ;;  %vm83_vm0 = vcmask 261120   ;;  %vm165_vm1 = vcmask 130048   ;;  %v272_v24 = vlaneseq }
  0x4a   :  { %v184_v2 = vld [vmem:[#allocation12] sm:$0xff]  ;;  %v770_v3 = vpack.c.bf16 %v80_v1, %v79_v0  ;;  %v185_v4 = vld [vmem:[#allocation12 + $0x8] sm:$0xff]  ;;  %v81_v5 = vld [vmem:[#allocation11 + $0x10] sm:$0xff]  ;;  %v936_v16 = vmov 0.0   ;;  %vm937_vm2 = vmmov 0   ;;  %vm168_vm3 = vcmask 7168  }
  0x4b   :  { %v82_v6 = vld [vmem:[#allocation11 + $0x18] sm:$0xff]  ;;  %v778_v7 = vpack.c.bf16 %v185_v4, %v184_v2  ;;  %v77_v9 = vld [vmem:[#allocation6] sm:$0xff]  ;;  %v186_v10 = vld [vmem:[#allocation12 + $0x10] sm:$0xff]  ;;  %173 = vst.msk [vmem:[#allocation5] sm:$0xff] %vm165_vm1, %v936_v16  ;;  %v938_v17 = vmov -1e+30  }
  0x4c   :  { %v774_v8 = vpack.c.bf16 %v82_v6, %v81_v5  ;;  %v187_v11 = vld [vmem:[#allocation12 + $0x18] sm:$0xff]  ;;  %771 = vmatprep.subr.bf16.mxu0 %v770_v3  ;;  %736 = vmatprep.mubr.msk.f32.mxu0 %vm83_vm0, %v77_v9  ;;  %v182_v13 = vld [vmem:[#allocation9] sm:$0xff]  ;;  %v78_v14 = vld [vmem:[#allocation6 + $0x8] sm:$0xff]  ;;  %174 = vst.msk [vmem:[#allocation5 + $0x8] sm:$0xff] %vm165_vm1, %v936_v16  ;;  %v273_v25 = vshrl.u32 %v272_v24, 7  ;;  %v277_v26 = vand.u32 127, %v272_v24 }
  0x4d   :  { %v782_v12 = vpack.c.bf16 %v187_v11, %v186_v10  ;;  %773 = vmatpush3.bf16.msra.mxu0 %v770_v3  ;;  %779 = vmatprep.subr.bf16.mxu1 %v778_v7  ;;  %v183_v15 = vld [vmem:[#allocation9 + $0x8] sm:$0xff]  ;;  %169 = vst.msk [vmem:[#allocation3] sm:$0xff] %vm168_vm3, %v938_v17  ;;  %170 = vst.msk [vmem:[#allocation3 + $0x8] sm:$0xff] %vm168_vm3, %v938_v17  ;;  %vm437_vm5 = vcmask 64512   ;;  %v939_v36 = vmov 0   ;;  %s940_s3 = smov 112  }
  0x4e   :  { %775 = vmatprep.subr.bf16.mxu0 %v774_v8  ;;  %781 = vmatpush3.bf16.msra.mxu1 %v778_v7  ;;  %171 = vst.msk [vmem:[#allocation4] sm:$0xff] %vm168_vm3, %v936_v16  ;;  %172 = vst.msk [vmem:[#allocation4 + $0x8] sm:$0xff] %vm168_vm3, %v936_v16  ;;  %vm280_vm4 = vcmp.le.s32.totalorder %v277_v26, %v273_v25  ;;  %s941_s12 = smov [#allocation14]  }
  0x4f   :  { %783 = vmatprep.subr.bf16.mxu1 %v782_v12  ;;  %747 = vmatprep.mubr.msk.f32.mxu1 %vm83_vm0, %v182_v13  ;;  %v281_v27 = vsel %vm280_vm4, 0.0, %v938_v17  ;;  %s684_s1 = sshll.u32 %s941_s12, 4  ;;  %s685_s1 = int_to_ptr.vmem [resolvable:$true] %s684_s1 }
  0x50   :  { %798 = vset.pattern.permute.xlu1 %v939_v36  ;;  %799 = vset.pattern.permute.xlu0 %v939_v36  ;;  %s900_s13 = scalar_lea.vmem %s685_s1, 256  ;;  %p905_p5 = scmp.lt.s32.totalorder %s685_s1, %s685_s1 }
  0x51   :  { %777 = vmatpush3.bf16.msra.mxu0 %v774_v8  ;;  %p901_p4 = scmp.ne.s32.totalorder %s685_s1, %s900_s13  ;;  %p906_p6 = scmp.lt.s32.totalorder %s900_s13, %s900_s13 }
  0x52   :  { %785 = vmatpush3.bf16.msra.mxu1 %v782_v12  ;;  %750 = vmatprep.subr.mxu0 %v936_v16  ;;  %v483_v9 = vld [vmem:[#allocation5] sm:$0xff] }
  0x53   :  { %755 = vmatprep.subr.mxu1 %v936_v16  ;;  %v484_v12 = vld [vmem:[#allocation5 + $0x8] sm:$0xff]  ;;  %p907_p7 = por %p906_p6, %p905_p5 }
  0x54   :  { %737 = vmatmul.mubr.msk.f32.vlgmr.msra.gmra.mrb[0].mxu0 %vm83_vm0, %v78_v14  ;;  %v435_v37 = vld [vmem:[#allocation3] sm:$0xff]  ;;  %v436_v40 = vld [vmem:[#allocation3 + $0x8] sm:$0xff] }
  0x55   :  { %748 = vmatmul.mubr.msk.f32.vlgmr.msra.gmra.mrb[0].mxu1 %vm83_vm0, %v183_v15  ;;  %752 = vmatprep.mubr.msk.f32.mxu0 %vm937_vm2, %v936_v16  ;;  %v468_v61 = vld [vmem:[#allocation4] sm:$0xff]  ;;  %v469_v0 = vld [vmem:[#allocation4 + $0x8] sm:$0xff]  ;;  %p908_p8 = pnand %p907_p7, %p901_p4 }
  0x56   :  { %757 = vmatprep.mubr.msk.f32.mxu1 %vm937_vm2, %v936_v16 }
 0x127   :  { %v738_v18 = vpop.f32.mrb[0].mxu0 }
 0x128   :  { %167 = vst.msk [vmem:[#allocation2 + $0x8] sm:$0xff] %vm165_vm1, %v738_v18  ;;  %v156_v19 = vpop.f32.mrb[1].mxu0  ;;  %v749_v20 = vpop.f32.mrb[0].mxu1 }
 0x129   :  { %166 = vst.msk [vmem:[#allocation2] sm:$0xff] %vm165_vm1, %v156_v19  ;;  %v261_v21 = vpop.f32.mrb[1].mxu1  ;;  %756 = vmatpush3.xpose.msk.msra.mxu1 %vm165_vm1, %v749_v20 }
 0x12a   :  { %751 = vmatpush3.xpose.msk.msra.mxu0 %vm165_vm1, %v261_v21  ;;  %765 = vmatprep.subr.mxu1 %v936_v16 }
 0x12b   :  { %760 = vmatprep.subr.mxu0 %v936_v16 }
 0x12f   :  { %v271_v22 = vld [vmem:[#allocation2 + $0x8] sm:$0xff] }
 0x130   :  { %758 = vmatmul.mubr.msk.f32.vlgmr.msra.gmra.mrb[2].mxu1 %vm165_vm1, %v271_v22  ;;  %v270_v23 = vld [vmem:[#allocation2] sm:$0xff] }
 0x131   :  { %753 = vmatmul.mubr.msk.f32.vlgmr.msra.gmra.mrb[2].mxu0 %vm165_vm1, %v270_v23  ;;  %767 = vmatprep.mubr.msk.f32.mxu1 %vm937_vm2, %v936_v16 }
 0x132   :  { %762 = vmatprep.mubr.msk.f32.mxu0 %vm937_vm2, %v936_v16 }
 0x203   :  { %v431_v28 = vpop.f32.mrb[2].mxu1 }
 0x204   :  { %v432_v29 = vadd.f32 %v431_v28, %v281_v27  ;;  %v355_v30 = vpop.f32.mrb[2].mxu0  ;;  %v759_v31 = vpop.f32.mrb[3].mxu1 }
 0x205   :  { %v356_v32 = vadd.f32 %v355_v30, %v281_v27  ;;  %v754_v33 = vpop.f32.mrb[3].mxu0 }
 0x206   :  { %v441_v35 = vsel %vm437_vm5, %v432_v29, -inf }
 0x207   :  { %v438_v34 = vsel %vm437_vm5, %v356_v32, -inf }
 0x208   :  { %439 = vmax.xlane.f32.xlu0 %v438_v34 }
 0x20c   :  { %442 = vmax.xlane.f32.xlu0 %v441_v35 }
 0x222   :  { %497 = vrot.lane.b32.xlu0 %v261_v21, %s940_s3 }
 0x295   :  { %v440_v38 = vpop.xlane.xlu0 %439 }
 0x296   :  { %v444_v39 = vmax.f32 %v435_v37, %v440_v38 }
 0x298   :  { %v446_v41 = vsub.f32 %v435_v37, %v444_v39  ;;  %653 = vst.msk [vmem:[#allocation3] sm:$0xff] %vm168_vm3, %v444_v39  ;;  %454 = vperm.xlu1 %798, %v444_v39  }
 0x299   :  { %v443_v42 = vpop.xlane.xlu0 %442 }
 0x29a   :  { %v445_v43 = vmax.f32 %v436_v40, %v443_v42  ;;  %v448_v56 = vmul.f32 1.442695, %v446_v41 }
 0x29c   :  { %v447_v44 = vsub.f32 %v436_v40, %v445_v43  ;;  %654 = vst.msk [vmem:[#allocation3 + $0x8] sm:$0xff] %vm168_vm3, %v445_v43  ;;  %459 = vperm.xlu1 %798, %v445_v43  }
 0x29d   :  { %v498_v45 = vpop.permute.xlu0 %497 }
 0x29e   :  { %761 = vmatpush3.msra.mxu0 %v498_v45  ;;  %v450_v58 = vmul.f32 1.442695, %v447_v44 }
 0x2a0   :  { %573 = vrot.lane.b32.xlu1 %v749_v20, %s940_s3 }
 0x317   :  { %v455_v46 = vpop.permute.xlu1 %454 }
 0x318   :  { %v462_v47 = vsub.f32 %v356_v32, %v455_v46 }
 0x31a   :  { %v464_v48 = vmul.f32 1.442695, %v462_v47 }
 0x31b   :  { %v460_v49 = vpop.permute.xlu1 %459 }
 0x31c   :  { %800 = vpow2.f32 %v464_v48  ;;  %v463_v50 = vsub.f32 %v432_v29, %v460_v49 }
 0x31e   :  { %v466_v51 = vmul.f32 1.442695, %v463_v50 }
 0x31f   :  { %v574_v52 = vpop.permute.xlu1 %573 }
 0x320   :  { %802 = vpow2.f32 %v466_v51  ;;  %766 = vmatpush3.msra.mxu1 %v574_v52 }
 0x321   :  { %804 = vpow2.f32 %v448_v56 }
 0x322   :  { %806 = vpow2.f32 %v450_v58 }
 0x326   :  { %v801_v53 = vpop.eup %800 }
 0x327   :  { %763 = vmatmul.mubr.msk.f32.vlgmr.msra.gmra.mrb[4].mxu0 %vm437_vm5, %v801_v53  ;;  %v472_v54 = vsel %vm437_vm5, %v801_v53, 0.0 }
 0x328   :  { %473 = vadd.xlane.f32.xlu1 %v472_v54 }
 0x32a   :  { %v803_v55 = vpop.eup %802 }
 0x32b   :  { %768 = vmatmul.mubr.msk.f32.vlgmr.msra.gmra.mrb[4].mxu1 %vm437_vm5, %v803_v55  ;;  %v475_v57 = vsel %vm437_vm5, %v803_v55, 0.0  ;;  %v805_v59 = vpop.eup %804 }
 0x32c   :  { %476 = vadd.xlane.f32.xlu0 %v475_v57  ;;  %v807_v60 = vpop.eup %806  ;;  %v470_v62 = vmul.f32 %v805_v59, %v468_v61 }
 0x32d   :  { %v471_v2 = vmul.f32 %v807_v60, %v469_v0 }
 0x339   :  { %487 = vperm.xlu1 %798, %v805_v59  }
 0x342   :  { %492 = vperm.xlu0 %799, %v807_v60  }
 0x3b5   :  { %v474_v63 = vpop.xlane.xlu1 %473 }
 0x3b6   :  { %v478_v1 = vadd.f32 %v474_v63, %v470_v62 }
 0x3b8   :  { %481 = vst.msk [vmem:[#allocation4] sm:$0xff] %vm168_vm3, %v478_v1 }
 0x3b9   :  { %v477_v3 = vpop.xlane.xlu0 %476  ;;  %v488_v10 = vpop.permute.xlu1 %487 }
 0x3ba   :  { %v479_v4 = vadd.f32 %v477_v3, %v471_v2  ;;  %v495_v11 = vmul.f32 %v488_v10, %v483_v9 }
 0x3bc   :  { %482 = vst.msk [vmem:[#allocation4 + $0x8] sm:$0xff] %vm168_vm3, %v479_v4 }
 0x3bf   :  { %v658_v5 = vld [vmem:[#allocation4] sm:$0xff] }
 0x3c0   :  { %808 = vrcp.f32 %v658_v5 }
 0x3c1   :  { %v493_v13 = vpop.permute.xlu0 %492 }
 0x3c2   :  { %v496_v17 = vmul.f32 %v493_v13, %v484_v12 }
 0x3c3   :  { %v659_v6 = vld [vmem:[#allocation4 + $0x8] sm:$0xff] }
 0x3c4   :  { %810 = vrcp.f32 %v659_v6 }
 0x3ca   :  { %v809_v7 = vpop.eup %808 }
 0x3cb   :  { %666 = vperm.xlu1 %798, %v809_v7  }
 0x3ce   :  { %v811_v8 = vpop.eup %810 }
 0x3cf   :  { %671 = vperm.xlu1 %798, %v811_v8  }
 0x3fa   :  { %v569_v14 = vpop.f32.mrb[4].mxu0 }
 0x3fb   :  { %v649_v15 = vadd.f32 %v569_v14, %v495_v11  ;;  %v764_v16 = vpop.f32.mrb[5].mxu0 }
 0x3fd   :  { %651 = vst.msk [vmem:[#allocation5] sm:$0xff] %vm165_vm1, %v649_v15 }
 0x3fe   :  { %v645_v18 = vpop.f32.mrb[4].mxu1 }
 0x3ff   :  { %v650_v19 = vadd.f32 %v645_v18, %v496_v17  ;;  %v769_v20 = vpop.f32.mrb[5].mxu1 }
 0x401   :  { %652 = vst.msk [vmem:[#allocation5 + $0x8] sm:$0xff] %vm165_vm1, %v650_v19 }
 0x404   :  { %v662_v22 = vld [vmem:[#allocation5] sm:$0xff] }
 0x408   :  { %v663_v25 = vld [vmem:[#allocation5 + $0x8] sm:$0xff] }
 0x44a   :  { %v667_v21 = vpop.permute.xlu1 %666 }
 0x44b   :  { %v674_v23 = vmul.f32 %v667_v21, %v662_v22 }
 0x44d   :  { %677 = vst.msk [vmem:[#allocation14] sm:$0xff] %vm165_vm1, %v674_v23 }
 0x44e   :  { %v672_v24 = vpop.permute.xlu1 %671 }
 0x44f   :  { %v675_v26 = vmul.f32 %v672_v24, %v663_v25 }
 0x451   :  { %678 = vst.msk [vmem:[#allocation14 + $0x8] sm:$0xff] %vm165_vm1, %v675_v26 }
 0x452   :  { %911 = shalt.err (!%p908_p8)
}
 0x453   :  { %s912_s16 = scalar_lea.hbm %s1094_s4, 256 }
 0x454   :  { %p913_p9 = scmp.ne.s32.totalorder %s1094_s4, %s912_s16  ;;  %p916_p10 = scmp.lt.u32.totalorder %s912_s16, %s1094_s4 }
 0x456   :  { %p918_p11 = pnand %p916_p10, %p913_p9 }
 0x458   :  { %921 = shalt.err (!%p918_p11)
}
 0x459   :  { %690 = dma.vmem_to_hbm [thread:$0]  %s685_s1, 256, %s1094_s4, [#allocation8], %s932_s27, %s932_s27, %s933_s28  }
 0x45a   :  { %928 = dma.done.wait [#allocation8], 256  }
 0x45b   :  { %929 = vsyncadd [#allocation8], 4294967040 }
 0x45c   :  { %694 = vsyncpa [#allocation7], 1 }
 0x45d   :  { %695 = vsyncpa [#allocation10], 1 }
 0x45e   :  { %696 = vsyncpa [#allocation13], 1 }
 0x45f   :  { %697 = vsyncpa [#allocation8], 1 }

</bundles_post_ra>
